<compile_context>
chip_gen: v6e
topology: v6e:2x2x1
jax: 0.10.0
libtpu: 0.0.40
codegen_flags: <defaults>
</compile_context>

<pallas_src>
import functools
import math

import jax
import jax.numpy as jnp
import numpy as np
from jax.experimental import pallas as pl
from jax.experimental.pallas import tpu as pltpu


def _round_up(x: int, m: int) -> int:
    return ((x + m - 1) // m) * m


# ---------------------------------------------------------------------------
# Fast path: embedding table resident in VMEM (small tables).
# ---------------------------------------------------------------------------
def _embed_vmem_kernel(ids_ref, emb_ref, out_ref, *, scale, tokens_per_tile):
    # ids_ref : (N_pad,)  int32, SMEM (scalar prefetch)
    # emb_ref : (V, D)    VMEM-resident table block
    # out_ref : (TM, D)   VMEM output block
    base = pl.program_id(0) * tokens_per_tile

    def body(t, carry):
        row = ids_ref[base + t]
        out_ref[pl.ds(t, 1), :] = (
            emb_ref[pl.ds(row, 1), :] * scale
        ).astype(out_ref.dtype)
        return carry

    jax.lax.fori_loop(0, tokens_per_tile, body, 0, unroll=8)


# ---------------------------------------------------------------------------
# Large-table path: table stays in HBM; per-row DMA gather directly into the
# output block, one aggregate semaphore wait, in-place scale.
# ---------------------------------------------------------------------------
def _embed_dma_kernel(ids_ref, emb_hbm, out_ref, sem, *, scale, tokens_per_tile):
    # ids_ref : (N_pad,)  int32, SMEM (scalar prefetch)
    # emb_hbm : (V, D)    HBM (raw ref, manual DMA)
    # out_ref : (TM, D)   VMEM output block (DMA target + in-place scale)
    # sem     : (1,)      DMA semaphore
    base = pl.program_id(0) * tokens_per_tile

    # 1) Issue one row DMA per token, straight into the output block.
    def issue(t, carry):
        row = ids_ref[base + t]
        pltpu.make_async_copy(
            emb_hbm.at[pl.ds(row, 1), :],      # (1, D) row in HBM
            out_ref.at[pl.ds(t, 1), :],        # (1, D) slot in the output block
            sem.at[0],
        ).start()
        return carry

    jax.lax.fori_loop(0, tokens_per_tile, issue, 0, unroll=8)

    # 2) Single aggregate wait: the DMA semaphore counts bytes, so one wait on
    #    a (TM, D)-shaped descriptor equals TM waits of (1, D) each.
    pltpu.make_async_copy(
        emb_hbm.at[pl.ds(0, tokens_per_tile), :],   # dummy src; shape/bytes only
        out_ref,
        sem.at[0],
    ).wait()

    # 3) Scale in place (one VPU pass, lane-dense store).
    out_ref[...] = (out_ref[...] * scale).astype(out_ref.dtype)


# ---------------------------------------------------------------------------
# Wrapper
# ---------------------------------------------------------------------------
def input_embeddings(ids, emb_table, *, token_tile=256,
                     vmem_table_bytes=8 * 1024 * 1024):
    """Pallas equivalent of InputEmbeddings.forward: embedding(x) * sqrt(d_model)."""
    b, s = ids.shape
    vocab, d_model = emb_table.shape
    n = b * s

    ids_flat = ids.reshape(n).astype(jnp.int32)

    itemsize = emb_table.dtype.itemsize
    sub = 8 if itemsize >= 4 else (16 if itemsize == 2 else 32)

    # Token tile: large enough to amortize per-step overhead, multiple of the
    # sublane packing, clamped to the token count.
    tm = _round_up(min(int(token_tile), n), sub)
    # Ensure >= 2 grid steps when possible so both TensorCores (v7x) get tiles.
    if _round_up(n, tm) // tm < 2 and n > sub:
        tm = _round_up(-(-n // 2), sub)
    n_pad = _round_up(n, tm)
    if n_pad != n:
        ids_flat = jnp.pad(ids_flat, (0, n_pad - n))  # pad with id 0 (valid row)
    g = n_pad // tm

    scale = float(math.sqrt(d_model))
    table_bytes = vocab * d_model * itemsize
    out_tile_bytes = tm * d_model * itemsize

    # Small tables live in VMEM; also required whenever vocab < tm so the
    # aggregate-wait dummy slice in the DMA path is always in-bounds.
    use_vmem_table = (table_bytes <= int(vmem_table_bytes)) or (vocab < tm)

    if use_vmem_table:
        kernel = functools.partial(
            _embed_vmem_kernel, scale=scale, tokens_per_tile=tm)
        in_specs = [pl.BlockSpec((vocab, d_model), lambda i, ids_sref: (0, 0))]
        scratch_shapes = []
        needed_bytes = 2 * table_bytes + 2 * out_tile_bytes
    else:
        kernel = functools.partial(
            _embed_dma_kernel, scale=scale, tokens_per_tile=tm)
        in_specs = [pl.BlockSpec(memory_space=pl.ANY)]   # table stays in HBM
        scratch_shapes = [pltpu.SemaphoreType.DMA((1,))]
        needed_bytes = 2 * out_tile_bytes

    # Explicit VMEM budget (output is auto double-buffered); capped at 64 MiB
    # so it is valid on v7x and still raises v5e's 16 MiB scoped default.
    vmem_limit = int(min(64 * 1024 * 1024,
                         max(32 * 1024 * 1024, needed_bytes + (4 << 20))))

    out_flat = pl.pallas_call(
        kernel,
        out_shape=jax.ShapeDtypeStruct((n_pad, d_model), emb_table.dtype),
        grid_spec=pltpu.PrefetchScalarGridSpec(
            num_scalar_prefetch=1,                     # ids -> SMEM
            grid=(g,),
            in_specs=in_specs,
            out_specs=pl.BlockSpec((tm, d_model), lambda i, ids_sref: (i, 0)),
            scratch_shapes=scratch_shapes,
        ),
        compiler_params=pltpu.CompilerParams(
            dimension_semantics=("parallel",),         # megacore-shard token tiles
            vmem_limit_bytes=vmem_limit,
        ),
    )(ids_flat, emb_table)

    return out_flat[:n].reshape(b, s, d_model)


# ---------------------------------------------------------------------------
# Self-check
# ---------------------------------------------------------------------------
def _check(batch, seq, vocab_size, d_model, key, **kwargs):
    k_ids, k_emb = jax.random.split(key)
    emb_table = jax.random.normal(k_emb, (vocab_size, d_model), dtype=jnp.float32)
    ids = jax.random.randint(k_ids, (batch, seq), 0, vocab_size, dtype=jnp.int32)

    out = input_embeddings(ids, emb_table, **kwargs)
    out = jax.block_until_ready(out)

    ref = jnp.take(emb_table, ids, axis=0) * math.sqrt(d_model)
    assert out.shape == (batch, seq, d_model)
    np.testing.assert_allclose(np.asarray(out), np.asarray(ref),
                               rtol=1e-6, atol=1e-6)


if __name__ == "__main__":
    key = jax.random.PRNGKey(0)
    k0, k1, k2 = jax.random.split(key, 3)

    # Small shapes consistent with the module (lane-dense d_model).
    # VMEM-resident fast path.
    _check(batch=2, seq=8, vocab_size=512, d_model=128, key=k0)
    # Fast path + non-multiple-of-tile padding.
    _check(batch=2, seq=7, vocab_size=512, d_model=128, key=k1)
    # Force the HBM DMA-gather path (aggregate wait, in-place scale).
    _check(batch=2, seq=8, vocab_size=512, d_model=128, key=k2,
           vmem_table_bytes=0)

    print("KERNEL_OK")
</pallas_src>

<mosaic_0001>
module attributes {stable_mosaic.version = 11 : i64} {
  func.func @_embed_vmem_kernel(%arg0: i32, %arg1: memref<16xi32, #tpu.memory_space<smem>>, %arg2: memref<512x128xf32, #tpu.memory_space<vmem>>, %arg3: memref<8x128xf32, #tpu.memory_space<vmem>>) attributes {dimension_semantics = [#tpu.dimension_semantics<parallel>], iteration_bounds = array<i64: 2>, scalar_prefetch = 1 : i64, scratch_operands = 0 : i64, tpu.core_type = #tpu.core_type<tc>, window_params = [{pipeline_mode = #tpu.pipeline_mode<synchronous>, transform_indices = @transform_0, window_bounds = array<i64: 512, 128>}, {transform_indices = @transform_1, window_bounds = array<i64: 8, 128>}]} {
    %c8_i32 = arith.constant 8 : i32
    %0 = arith.muli %arg0, %c8_i32 : i32
    %c0_i32 = arith.constant 0 : i32
    %1 = arith.addi %0, %c0_i32 : i32
    %2 = arith.index_cast %1 : i32 to index
    %3 = memref.load %arg1[%2] : memref<16xi32, #tpu.memory_space<smem>>
    %4 = arith.index_cast %3 : i32 to index
    %c0 = arith.constant 0 : index
    %5 = vector.load %arg2[%4, %c0] : memref<512x128xf32, #tpu.memory_space<vmem>>, vector<1x128xf32>
    %cst = arith.constant 11.3137083 : f32
    %6 = vector.broadcast %cst : f32 to vector<1x128xf32>
    %7 = arith.mulf %5, %6 : vector<1x128xf32>
    %8 = arith.index_cast %c0_i32 : i32 to index
    %c0_0 = arith.constant 0 : index
    %9 = vector.load %arg3[%8, %c0_0] : memref<8x128xf32, #tpu.memory_space<vmem>>, vector<1x128xf32>
    tpu.vector_store %arg3[%8, %c0_0], %7 {strides = array<i32>} : memref<8x128xf32, #tpu.memory_space<vmem>>, vector<1x128xf32>,
    %c1_i32 = arith.constant 1 : i32
    %10 = arith.addi %0, %c1_i32 : i32
    %11 = arith.index_cast %10 : i32 to index
    %12 = memref.load %arg1[%11] : memref<16xi32, #tpu.memory_space<smem>>
    %13 = arith.index_cast %12 : i32 to index
    %c0_1 = arith.constant 0 : index
    %14 = vector.load %arg2[%13, %c0_1] : memref<512x128xf32, #tpu.memory_space<vmem>>, vector<1x128xf32>
    %cst_2 = arith.constant 11.3137083 : f32
    %15 = vector.broadcast %cst_2 : f32 to vector<1x128xf32>
    %16 = arith.mulf %14, %15 : vector<1x128xf32>
    %17 = arith.index_cast %c1_i32 : i32 to index
    %c0_3 = arith.constant 0 : index
    %18 = vector.load %arg3[%17, %c0_3] : memref<8x128xf32, #tpu.memory_space<vmem>>, vector<1x128xf32>
    tpu.vector_store %arg3[%17, %c0_3], %16 {strides = array<i32>} : memref<8x128xf32, #tpu.memory_space<vmem>>, vector<1x128xf32>,
    %c2_i32 = arith.constant 2 : i32
    %19 = arith.addi %0, %c2_i32 : i32
    %20 = arith.index_cast %19 : i32 to index
    %21 = memref.load %arg1[%20] : memref<16xi32, #tpu.memory_space<smem>>
    %22 = arith.index_cast %21 : i32 to index
    %c0_4 = arith.constant 0 : index
    %23 = vector.load %arg2[%22, %c0_4] : memref<512x128xf32, #tpu.memory_space<vmem>>, vector<1x128xf32>
    %cst_5 = arith.constant 11.3137083 : f32
    %24 = vector.broadcast %cst_5 : f32 to vector<1x128xf32>
    %25 = arith.mulf %23, %24 : vector<1x128xf32>
    %26 = arith.index_cast %c2_i32 : i32 to index
    %c0_6 = arith.constant 0 : index
    %27 = vector.load %arg3[%26, %c0_6] : memref<8x128xf32, #tpu.memory_space<vmem>>, vector<1x128xf32>
    tpu.vector_store %arg3[%26, %c0_6], %25 {strides = array<i32>} : memref<8x128xf32, #tpu.memory_space<vmem>>, vector<1x128xf32>,
    %c3_i32 = arith.constant 3 : i32
    %28 = arith.addi %0, %c3_i32 : i32
    %29 = arith.index_cast %28 : i32 to index
    %30 = memref.load %arg1[%29] : memref<16xi32, #tpu.memory_space<smem>>
    %31 = arith.index_cast %30 : i32 to index
    %c0_7 = arith.constant 0 : index
    %32 = vector.load %arg2[%31, %c0_7] : memref<512x128xf32, #tpu.memory_space<vmem>>, vector<1x128xf32>
    %cst_8 = arith.constant 11.3137083 : f32
    %33 = vector.broadcast %cst_8 : f32 to vector<1x128xf32>
    %34 = arith.mulf %32, %33 : vector<1x128xf32>
    %35 = arith.index_cast %c3_i32 : i32 to index
    %c0_9 = arith.constant 0 : index
    %36 = vector.load %arg3[%35, %c0_9] : memref<8x128xf32, #tpu.memory_space<vmem>>, vector<1x128xf32>
    tpu.vector_store %arg3[%35, %c0_9], %34 {strides = array<i32>} : memref<8x128xf32, #tpu.memory_space<vmem>>, vector<1x128xf32>,
    %c4_i32 = arith.constant 4 : i32
    %37 = arith.addi %0, %c4_i32 : i32
    %38 = arith.index_cast %37 : i32 to index
    %39 = memref.load %arg1[%38] : memref<16xi32, #tpu.memory_space<smem>>
    %40 = arith.index_cast %39 : i32 to index
    %c0_10 = arith.constant 0 : index
    %41 = vector.load %arg2[%40, %c0_10] : memref<512x128xf32, #tpu.memory_space<vmem>>, vector<1x128xf32>
    %cst_11 = arith.constant 11.3137083 : f32
    %42 = vector.broadcast %cst_11 : f32 to vector<1x128xf32>
    %43 = arith.mulf %41, %42 : vector<1x128xf32>
    %44 = arith.index_cast %c4_i32 : i32 to index
    %c0_12 = arith.constant 0 : index
    %45 = vector.load %arg3[%44, %c0_12] : memref<8x128xf32, #tpu.memory_space<vmem>>, vector<1x128xf32>
    tpu.vector_store %arg3[%44, %c0_12], %43 {strides = array<i32>} : memref<8x128xf32, #tpu.memory_space<vmem>>, vector<1x128xf32>,
    %c5_i32 = arith.constant 5 : i32
    %46 = arith.addi %0, %c5_i32 : i32
    %47 = arith.index_cast %46 : i32 to index
    %48 = memref.load %arg1[%47] : memref<16xi32, #tpu.memory_space<smem>>
    %49 = arith.index_cast %48 : i32 to index
    %c0_13 = arith.constant 0 : index
    %50 = vector.load %arg2[%49, %c0_13] : memref<512x128xf32, #tpu.memory_space<vmem>>, vector<1x128xf32>
    %cst_14 = arith.constant 11.3137083 : f32
    %51 = vector.broadcast %cst_14 : f32 to vector<1x128xf32>
    %52 = arith.mulf %50, %51 : vector<1x128xf32>
    %53 = arith.index_cast %c5_i32 : i32 to index
    %c0_15 = arith.constant 0 : index
    %54 = vector.load %arg3[%53, %c0_15] : memref<8x128xf32, #tpu.memory_space<vmem>>, vector<1x128xf32>
    tpu.vector_store %arg3[%53, %c0_15], %52 {strides = array<i32>} : memref<8x128xf32, #tpu.memory_space<vmem>>, vector<1x128xf32>,
    %c6_i32 = arith.constant 6 : i32
    %55 = arith.addi %0, %c6_i32 : i32
    %56 = arith.index_cast %55 : i32 to index
    %57 = memref.load %arg1[%56] : memref<16xi32, #tpu.memory_space<smem>>
    %58 = arith.index_cast %57 : i32 to index
    %c0_16 = arith.constant 0 : index
    %59 = vector.load %arg2[%58, %c0_16] : memref<512x128xf32, #tpu.memory_space<vmem>>, vector<1x128xf32>
    %cst_17 = arith.constant 11.3137083 : f32
    %60 = vector.broadcast %cst_17 : f32 to vector<1x128xf32>
    %61 = arith.mulf %59, %60 : vector<1x128xf32>
    %62 = arith.index_cast %c6_i32 : i32 to index
    %c0_18 = arith.constant 0 : index
    %63 = vector.load %arg3[%62, %c0_18] : memref<8x128xf32, #tpu.memory_space<vmem>>, vector<1x128xf32>
    tpu.vector_store %arg3[%62, %c0_18], %61 {strides = array<i32>} : memref<8x128xf32, #tpu.memory_space<vmem>>, vector<1x128xf32>,
    %c7_i32 = arith.constant 7 : i32
    %64 = arith.addi %0, %c7_i32 : i32
    %65 = arith.index_cast %64 : i32 to index
    %66 = memref.load %arg1[%65] : memref<16xi32, #tpu.memory_space<smem>>
    %67 = arith.index_cast %66 : i32 to index
    %c0_19 = arith.constant 0 : index
    %68 = vector.load %arg2[%67, %c0_19] : memref<512x128xf32, #tpu.memory_space<vmem>>, vector<1x128xf32>
    %cst_20 = arith.constant 11.3137083 : f32
    %69 = vector.broadcast %cst_20 : f32 to vector<1x128xf32>
    %70 = arith.mulf %68, %69 : vector<1x128xf32>
    %71 = arith.index_cast %c7_i32 : i32 to index
    %c0_21 = arith.constant 0 : index
    %72 = vector.load %arg3[%71, %c0_21] : memref<8x128xf32, #tpu.memory_space<vmem>>, vector<1x128xf32>
    tpu.vector_store %arg3[%71, %c0_21], %70 {strides = array<i32>} : memref<8x128xf32, #tpu.memory_space<vmem>>, vector<1x128xf32>,
    %c8_i32_22 = arith.constant 8 : i32
    return
  }
  func.func @transform_0(%arg0: i32, %arg1: memref<16xi32, #tpu.memory_space<smem>>) -> (i32, i32) {
    %c0_i32 = arith.constant 0 : i32
    %c0_i32_0 = arith.constant 0 : i32
    %c0_i32_1 = arith.constant 0 : i32
    return %c0_i32, %c0_i32_0 : i32, i32
  }
  func.func @transform_1(%arg0: i32, %arg1: memref<16xi32, #tpu.memory_space<smem>>) -> (i32, i32) {
    %c0_i32 = arith.constant 0 : i32
    %c0_i32_0 = arith.constant 0 : i32
    return %arg0, %c0_i32 : i32, i32
  }
}

</mosaic_0001>

<bundles_post_ra>
// kernel: tpu_custom_call.1
= control target key start
LH: loop header
LB: loop body
LE: loop exit
PB: predicated region body
PF: predicated region fallthrough
CT: control target
= control target key end

     0   :  { %s410_s9 = smov [#allocation3]   ;;  %s555_s0 = inlined_call_operand.hbm [shape: s32[16], index: 0, kind: input, shape index: {}]   ;;  %s556_s1 = inlined_call_operand.hbm [shape: f32[512,128], index: 1, kind: input, shape index: {}]   ;;  %s557_s2 = inlined_call_operand.hbm [shape: f32[16,128], index: 2, kind: output, shape index: {}]  }
   0x1   :  { %8 = dma.hbm_to_smem %s555_s0, 16, %s410_s9, [#allocation2] }
   0x2   :  { %384 = dma.done.wait [#allocation2], 16 }
   0x3   :  { %385 = vsyncadd [#allocation2], 4294967280 }
   0x4   :  { %10 = sfence }
   0x5   :  { %11 = vsyncpa [#allocation5], 0 }
   0x6   :  { %12 = vsyncpa [#allocation6], 0 }
   0x7   :  { %14 = vsyncpa [#allocation6 + $0x1], 0  ;;  %s433_s12 = smov 0   ;;  %s435_s13 = smov 0  }
   0x8   :  { %s437_s14 = smov 0   ;;  %s439_s15 = smov 0  }
   0x9 LB: > { %s454_s0 = sadd.s32 4294967295, %s408_s15   ;;  %s244_s16 = sadd.s32 4294967294, %s408_s15   ;;  %s408_s15 = sphi %s439_s15, %s565_s15   ;;  %s404_s14 = sphi %s437_s14, %s564_s14   ;;  %s400_s13 = sphi %s435_s13, %s563_s13   ;;  %s396_s12 = sphi %s433_s12, %s562_s12  }
   0xa   : > { %s458_s17 = sadd.s32 1, %s408_s15   ;;  %s48_s18 = sadd.s32 1, %s404_s14 }
   0xb   : > { %s45_s19 = ssub.s32 %s408_s15, %s458_s17  ;;  %p58_p0 = scmp.ne.s32.totalorder %s404_s14, %s400_s13 }
   0xc   : > { %p46_p1 = scmp.eq.s32.totalorder %s45_s19, 0  ;;  %p59_p2 = scmp.eq.s32.totalorder %s454_s0, 1 }
   0xd   : > { %p64_p3 = scmp.ne.s32.totalorder %s400_s13, %s396_s12  ;;  %p65_p4 = scmp.eq.s32.totalorder %s244_s16, 1 }
   0xe   : > { %s469_s20 = scalar_select %p46_p1, %s404_s14, %s48_s18  }
   0xf   : > { %p471_p5 = por %p59_p2, %p58_p0  ;;  %p475_p6 = por %p65_p4, %p64_p3 }
  0x10   : > { %p245_p7 = scmp.ge.s32.totalorder %s408_s15, 1  ;;  %p72_p8 = scmp.lt.s32.totalorder %s408_s15, 3 }
  0x11   : > { %s559_s22 = scalar_select %p475_p6, 1, 0 }
  0x12   : > { %p269_p9 = scmp.eq.s32.totalorder %s454_s0, 0  ;;  %p482_p10 = pnand %p245_p7, %p72_p8 }
  0x13   : > { %s411_s24 = smov [#allocation4]  }
  0x14   : > { %s84_s25 = sshll.u32 %s411_s24, 4  ;;  %p261_p11 = pneg %p482_p10  ;;  %s85_s25 = int_to_ptr.vmem [resolvable:$true] %s84_s25 }
  0x15   : > { %s327_s26 = scalar_lea.vmem %s85_s25, 8192  ;;  %p335_p3 = scmp.lt.s32.totalorder %s85_s25, %s85_s25 }
  0x16   : > { %p262_p12 = pnand %p269_p9, %p261_p11  ;;  %p328_p0 = scmp.ne.s32.totalorder %s85_s25, %s327_s26 }
  0x17   : > { %p336_p4 = scmp.lt.s32.totalorder %s327_s26, %s327_s26 }
  0x18   : > { %p318_p13 = pneg %p262_p12 }
  0x19   : > { %p337_p6 = por %p336_p4, %p335_p3 }
  0x1a   : > { %p330_p1 = pnand %p328_p0, %p318_p13 }
  0x1c   : > { %p331_p2 = pneg %p330_p1 }
  0x1e   : > { %p338_p7 = pnand %p337_p6, %p331_p2 }
  0x20   : > { %341 = shalt.err (!%p338_p7)
}
  0x21   : > { %s412_s27 = smov 128   ;;  %s413_s28 = smov 8  }
  0x22   : > { %264 = dma.hbm_to_vmem [thread:$0]  (!%p262_p12), %s556_s1, 8192, %s85_s25, [#allocation5], %s412_s27, %s412_s27, %s413_s28  }
  0x23   : > { %100 = sbr.rel (%p482_p10) target bundleno = 81 (0x51), region = 24 }
  0x28   : > { %387 = dma.done.wait (%p269_p9), [#allocation5], 8192  }
  0x29   : > { %389 = vsyncadd (%p269_p9), [#allocation5], 4294959104  ;;  %s112_s3 = sand.u32 1, %s400_s13   ;;  %s250_s4 = sshll.u32 %s454_s0, 3 }
  0x2a   : > { %s249_s5 = sshll.u32 %s112_s3, 3  ;;  %s116_s6 = sld [smem:[#allocation3 + %s250_s4]] }
  0x2b   : > { %s121_s7 = sadd.s32 1, %s250_s4  ;;  %s127_s8 = sadd.s32 2, %s250_s4 }
  0x2c   : > { %s122_s9 = sld [smem:[#allocation3 + %s121_s7]]  ;;  %s133_s10 = sadd.s32 3, %s250_s4 }
  0x2d   : > { %s128_s11 = sld [smem:[#allocation3 + %s127_s8]]  ;;  %s139_s16 = sadd.s32 4, %s250_s4 }
  0x2e   : > { %s134_s18 = sld [smem:[#allocation3 + %s133_s10]]  ;;  %s145_s19 = sadd.s32 5, %s250_s4 }
  0x2f   : > { %s140_s23 = sld [smem:[#allocation3 + %s139_s16]]  ;;  %s151_s26 = sadd.s32 6, %s250_s4 }
  0x30   : > { %s117_s24 = scalar_lea.vmem [#allocation4], %s116_s6  ;;  %s146_s25 = sld [smem:[#allocation3 + %s145_s19]] }
  0x31   : > { %v118_v0 = vld [vmem:[%s117_s24] sm:$0x1]  ;;  %s152_s27 = sld [smem:[#allocation3 + %s151_s26]]  ;;  %s157_s28 = sadd.s32 7, %s250_s4 }
  0x32   : > { %v119_v1 = vmul.f32 11.313708, %v118_v0  ;;  %s158_s29 = sld [smem:[#allocation3 + %s157_s28]]  ;;  %s503_s30 = scalar_lea.vmem [#allocation7], %s249_s5 }
  0x33   : > { %s123_s7 = scalar_lea.vmem [#allocation4], %s122_s9  ;;  %s129_s6 = scalar_lea.vmem [#allocation4], %s128_s11 }
  0x34   : > { %120 = vst [vmem:[%s503_s30] sm:$0x1] %v119_v1  ;;  %v124_v2 = vld [vmem:[%s123_s7] sm:$0x1]  ;;  %s135_s8 = scalar_lea.vmem [#allocation4], %s134_s18  ;;  %s252_s5 = sshll.u32 %s454_s0, 7 }
  0x35   : > { %v125_v3 = vmul.f32 11.313708, %v124_v2  ;;  %v130_v4 = vld [vmem:[%s129_s6] sm:$0x1]  ;;  %s141_s4 = scalar_lea.vmem [#allocation4], %s140_s23  ;;  %s177_s10 = sshll.u32 %s503_s30, 4  ;;  %s178_s10 = int_to_ptr.vmem [resolvable:$true] %s177_s10 }
  0x36   : > { %v131_v5 = vmul.f32 11.313708, %v130_v4  ;;  %v136_v6 = vld [vmem:[%s135_s8] sm:$0x1]  ;;  %s147_s9 = scalar_lea.vmem [#allocation4], %s146_s25  ;;  %s516_s19 = scalar_lea.hbm %s557_s2, %s252_s5 }
  0x37   : > { %126 = vst [vmem:[%s503_s30 + $0x1] sm:$0x1] %v125_v3  ;;  %v137_v7 = vmul.f32 11.313708, %v136_v6  ;;  %v142_v8 = vld [vmem:[%s141_s4] sm:$0x1] }
  0x38   : > { %132 = vst [vmem:[%s503_s30 + $0x2] sm:$0x1] %v131_v5  ;;  %v143_v9 = vmul.f32 11.313708, %v142_v8  ;;  %v148_v10 = vld [vmem:[%s147_s9] sm:$0x1] }
  0x39   : > { %138 = vst [vmem:[%s503_s30 + $0x3] sm:$0x1] %v137_v7  ;;  %v149_v11 = vmul.f32 11.313708, %v148_v10  ;;  %s153_s11 = scalar_lea.vmem [#allocation4], %s152_s27  ;;  %s159_s16 = scalar_lea.vmem [#allocation4], %s158_s29 }
  0x3a   : > { %v154_v12 = vld [vmem:[%s153_s11] sm:$0x1]  ;;  %144 = vst [vmem:[%s503_s30 + $0x4] sm:$0x1] %v143_v9  ;;  %s164_s23 = scalar_lea.sflag [#allocation6], %s112_s3  ;;  %s342_s24 = scalar_lea.vmem %s178_s10, 128 }
  0x3b   : > { %v155_v13 = vmul.f32 11.313708, %v154_v12  ;;  %v160_v14 = vld [vmem:[%s159_s16] sm:$0x1]  ;;  %150 = vst [vmem:[%s503_s30 + $0x5] sm:$0x1] %v149_v11  ;;  %p343_p6 = scmp.ne.s32.totalorder %s178_s10, %s342_s24 }
  0x3c   : > { %v161_v15 = vmul.f32 11.313708, %v160_v14  ;;  %s414_s25 = smov [#allocation7]  }
  0x3d   : > { %156 = vst [vmem:[%s503_s30 + $0x6] sm:$0x1] %v155_v13  ;;  %p344_p8 = pnand %p343_p6, %p471_p5  ;;  %s346_s26 = sshll.u32 %s414_s25, 4  ;;  %s347_s26 = int_to_ptr.vmem [resolvable:$false] %s346_s26 }
  0x3e   : > { %162 = vst [vmem:[%s503_s30 + $0x7] sm:$0x1] %v161_v15  ;;  %s348_s27 = scalar_lea.vmem %s347_s26, 256  ;;  %p349_p10 = scmp.lt.s32.totalorder %s178_s10, %s347_s26 }
  0x3f   : > { %p345_p9 = pneg %p344_p8  ;;  %p350_p11 = scmp.lt.s32.totalorder %s348_s27, %s342_s24 }
  0x41   : > { %p351_p12 = por %p350_p11, %p349_p10 }
  0x43   : > { %p352_p13 = pnand %p351_p12, %p345_p9 }
  0x45   : > { %355 = shalt.err (!%p352_p13)
}
  0x46   : > { %s356_s28 = scalar_lea.hbm %s516_s19, 128  ;;  %s360_s30 = scalar_lea.hbm %s557_s2, 256 }
  0x47   : > { %p357_p0 = scmp.ne.s32.totalorder %s516_s19, %s356_s28  ;;  %p361_p3 = scmp.lt.s32.totalorder %s516_s19, %s557_s2 }
  0x48   : > { %p362_p4 = scmp.lt.s32.totalorder %s360_s30, %s356_s28 }
  0x49   : > { %p358_p1 = pnand %p357_p0, %p471_p5 }
  0x4a   : > { %p363_p7 = por %p362_p4, %p361_p3 }
  0x4b   : > { %p359_p2 = pneg %p358_p1 }
  0x4d   : > { %p364_p6 = pnand %p363_p7, %p359_p2 }
  0x4f   : > { %367 = shalt.err (!%p364_p6)
}
  0x50   : > { %259 = dma.vmem_to_hbm [thread:$0]  (%p471_p5), %s178_s10, 128, %s516_s19, %s164_s23  }
  0x51 PF: > { %p271_p8 = scmp.ge.s32.totalorder %s408_s15, 2  ;;  %s189_s8 = sand.u32 1, %s396_s12  }
  0x52   : > { %p561_p9 = scmp.ne.s32.totalorder %s559_s22, 0  ;;  %s190_s4 = scalar_lea.sflag [#allocation6], %s189_s8 }
  0x54   : > { %p266_p10 = pnand %p271_p8, %p561_p9 }
  0x56   : > { %p267_p11 = pneg %p266_p10 }
  0x58   : > { %391 = dma.done.wait (%p267_p11), %s190_s4, 128  }
  0x59   : > { %393 = vsyncadd (%p267_p11), %s190_s4, 4294967168  ;;  %p17_p12 = scmp.ge.s32.totalorder %s458_s17, 4   ;;  %s562_s12 = smov %s400_s13 }
  0x5a   : > { %s563_s13 = smov %s404_s14  ;;  %s564_s14 = smov %s469_s20 }
  0x5b   : > { %s565_s15 = smov %s458_s17  ;;  %19 = sbr.rel (!%p17_p12) target bundleno = 9 (0x9), region = 69 }
  0x60   :  { %195 = vsyncpa [#allocation5], 1 }
  0x61   :  { %197 = vsyncpa [#allocation5 + $0x1], 1 }
  0x62   :  { %198 = vsyncpa [#allocation6], 1 }
  0x63   :  { %200 = vsyncpa [#allocation6 + $0x1], 1 }

</bundles_post_ra>
